<compile_context>
chip_gen: v6e
topology: v6e:2x2x1
jax: 0.10.0
libtpu: 0.0.40
codegen_flags: <defaults>
</compile_context>

<pallas_src>
import functools

import jax
import jax.numpy as jnp
from jax.experimental import pallas as pl
from jax.experimental.pallas import tpu as pltpu

LANE = 128      # lane width  (last dim)
SUBLANE = 8     # sublane width (second-to-last dim)


def _round_up(n: int, m: int) -> int:
    return ((n + m - 1) // m) * m


def _fused_mlp_kernel(*refs):
    """refs = (x_ref, w0_ref, b0_ref, w1_ref, b1_ref, ..., o_ref).

    Computes h_{i+1} = relu(h_i @ W_i + b_i) for all layers with the activation
    kept resident in VMEM/vregs (never spilled to HBM between layers).
    """
    x_ref = refs[0]
    o_ref = refs[-1]
    wb = refs[1:-1]

    h = x_ref[...]
    for i in range(0, len(wb), 2):
        w = wb[i][...]          # (K_pad, N_pad), lane-dense
        b = wb[i + 1][...]      # (1, N_pad)  -> broadcasts over the batch tile
        h = jnp.dot(h, w, preferred_element_type=jnp.float32) + b
        h = jnp.maximum(h, 0.0)
    o_ref[...] = h.astype(o_ref.dtype)


def fc_embedding_forward(x, padded_params, *, out_dim: int, block_b: int = 256):
    """Fused MLP forward: one pallas_call for the whole network.

    x:             (B, input_dim) float32
    padded_params: list of (W_pad (K_pad, N_pad), b_pad (1, N_pad)), zero-padded
                   to multiples of 128 in both feature dims.
    out_dim:       true (unpadded) output dimensionality.
    """
    B, K = x.shape
    p_in = padded_params[0][0].shape[0]
    p_out = padded_params[-1][0].shape[1]

    # Batch tile: sublane-aligned, capped at block_b rows per grid step.
    tb = min(block_b, _round_up(B, SUBLANE))
    b_pad = _round_up(B, tb)

    # Zero-pad the input to a lane-dense, sublane-aligned slab.
    x_p = jnp.zeros((b_pad, p_in), x.dtype).at[:B, :K].set(x)

    grid = (b_pad // tb,)

    in_specs = [pl.BlockSpec((tb, p_in), lambda i: (i, 0))]
    inputs = [x_p]
    flops = 0
    bytes_accessed = x_p.size * x_p.dtype.itemsize
    for w, b in padded_params:
        kin, kout = w.shape
        in_specs.append(pl.BlockSpec((kin, kout), lambda i: (0, 0)))
        in_specs.append(pl.BlockSpec((1, kout), lambda i: (0, 0)))
        inputs.append(w)
        inputs.append(b)
        flops += 2 * b_pad * kin * kout
        bytes_accessed += (w.size + b.size) * w.dtype.itemsize
    bytes_accessed += b_pad * p_out * x.dtype.itemsize

    out_padded = pl.pallas_call(
        _fused_mlp_kernel,
        out_shape=jax.ShapeDtypeStruct((b_pad, p_out), x.dtype),
        grid=grid,
        in_specs=in_specs,
        out_specs=pl.BlockSpec((tb, p_out), lambda i: (i, 0)),
        compiler_params=pltpu.CompilerParams(
            dimension_semantics=("parallel",)),
        cost_estimate=pl.CostEstimate(
            flops=flops, transcendentals=0, bytes_accessed=bytes_accessed),
    )(*inputs)

    # Strip batch padding and padded output lanes.
    return out_padded[:B, :out_dim]


class FCEmbedding:
    """JAX/Pallas re-implementation of sbi_ice FCEmbedding forward pass."""

    def __init__(self, input_dim: int, output_dim: int = 20, num_layers: int = 2,
                 num_hiddens: int = 20, *, key: jax.Array, block_b: int = 256):
        assert num_layers >= 2
        dims = [input_dim] + [num_hiddens] * (num_layers - 1) + [output_dim]
        self.output_dim = output_dim
        self.params = []          # unpadded (for the pure-JAX reference)
        self.padded_params = []   # zero-padded to 128-lane multiples
        for i in range(num_layers):
            fan_in, fan_out = dims[i], dims[i + 1]
            key, kw, kb = jax.random.split(key, 3)
            bound = 1.0 / (fan_in ** 0.5)   # matches torch.nn.Linear default init
            w = jax.random.uniform(kw, (fan_in, fan_out), jnp.float32, -bound, bound)
            b = jax.random.uniform(kb, (1, fan_out), jnp.float32, -bound, bound)
            self.params.append((w, b))

            p_in = _round_up(fan_in, LANE)
            p_out = _round_up(fan_out, LANE)
            w_p = jnp.zeros((p_in, p_out), jnp.float32).at[:fan_in, :fan_out].set(w)
            b_p = jnp.zeros((1, p_out), jnp.float32).at[:, :fan_out].set(b)
            self.padded_params.append((w_p, b_p))

        # jit the whole forward so the fused kernel + pad/slice is one executable.
        self._forward = jax.jit(
            functools.partial(fc_embedding_forward,
                              out_dim=output_dim, block_b=block_b))

    def __call__(self, x: jax.Array) -> jax.Array:
        return self._forward(x, self.padded_params)


def _reference(x, params):
    """Pure-JAX reference (unpadded weights) for correctness checking."""
    for w, b in params:
        x = jnp.maximum(x @ w + b, 0.0)
    return x


if __name__ == "__main__":
    key = jax.random.PRNGKey(0)
    key, k_x, k_x2, k_p = jax.random.split(key, 4)

    batch, input_dim = 4, 16
    output_dim, num_layers, num_hiddens = 20, 3, 32

    net = FCEmbedding(input_dim, output_dim=output_dim, num_layers=num_layers,
                      num_hiddens=num_hiddens, key=k_p)

    # Small-batch check (single grid step, padded batch 4 -> 8).
    x = jax.random.normal(k_x, (batch, input_dim), jnp.float32)
    out = jax.block_until_ready(net(x))
    ref = _reference(x, net.params)
    assert out.shape == (batch, output_dim), out.shape
    assert jnp.allclose(out, ref, atol=1e-5, rtol=1e-5)

    # Multi-tile check: exercises the parallel batch grid + batch padding.
    batch2 = 200
    x2 = jax.random.normal(k_x2, (batch2, input_dim), jnp.float32)
    out2 = jax.block_until_ready(
        fc_embedding_forward(x2, net.padded_params, out_dim=output_dim, block_b=64))
    ref2 = _reference(x2, net.params)
    assert out2.shape == (batch2, output_dim), out2.shape
    assert jnp.allclose(out2, ref2, atol=1e-5, rtol=1e-5)

    print("KERNEL_OK")
</pallas_src>

<mosaic_0001>
module attributes {stable_mosaic.version = 11 : i64} {
  func.func @_fused_mlp_kernel(%arg0: i32, %arg1: memref<8x128xf32, #tpu.memory_space<vmem>>, %arg2: memref<128x128xf32, #tpu.memory_space<vmem>>, %arg3: memref<1x128xf32, #tpu.memory_space<vmem>>, %arg4: memref<128x128xf32, #tpu.memory_space<vmem>>, %arg5: memref<1x128xf32, #tpu.memory_space<vmem>>, %arg6: memref<128x128xf32, #tpu.memory_space<vmem>>, %arg7: memref<1x128xf32, #tpu.memory_space<vmem>>, %arg8: memref<8x128xf32, #tpu.memory_space<vmem>>) attributes {dimension_semantics = [#tpu.dimension_semantics<parallel>], iteration_bounds = array<i64: 1>, scalar_prefetch = 0 : i64, scratch_operands = 0 : i64, tpu.core_type = #tpu.core_type<tc>, window_params = [{transform_indices = @transform_0, window_bounds = array<i64: 8, 128>}, {pipeline_mode = #tpu.pipeline_mode<synchronous>, transform_indices = @transform_1, window_bounds = array<i64: 128, 128>}, {pipeline_mode = #tpu.pipeline_mode<synchronous>, transform_indices = @transform_2, window_bounds = array<i64: 1, 128>}, {pipeline_mode = #tpu.pipeline_mode<synchronous>, transform_indices = @transform_3, window_bounds = array<i64: 128, 128>}, {pipeline_mode = #tpu.pipeline_mode<synchronous>, transform_indices = @transform_4, window_bounds = array<i64: 1, 128>}, {pipeline_mode = #tpu.pipeline_mode<synchronous>, transform_indices = @transform_5, window_bounds = array<i64: 128, 128>}, {pipeline_mode = #tpu.pipeline_mode<synchronous>, transform_indices = @transform_6, window_bounds = array<i64: 1, 128>}, {transform_indices = @transform_7, window_bounds = array<i64: 8, 128>}]} {
    %c0 = arith.constant 0 : index
    %c0_0 = arith.constant 0 : index
    %0 = vector.load %arg1[%c0, %c0_0] : memref<8x128xf32, #tpu.memory_space<vmem>>, vector<8x128xf32>
    %c0_1 = arith.constant 0 : index
    %c0_2 = arith.constant 0 : index
    %1 = vector.load %arg2[%c0_1, %c0_2] : memref<128x128xf32, #tpu.memory_space<vmem>>, vector<128x128xf32>
    %c0_3 = arith.constant 0 : index
    %c0_4 = arith.constant 0 : index
    %2 = vector.load %arg3[%c0_3, %c0_4] : memref<1x128xf32, #tpu.memory_space<vmem>>, vector<1x128xf32>
    %cst = arith.constant dense<0.000000e+00> : vector<8x128xf32>
    %3 = tpu.matmul %0, %1, %cst {dimension_numbers = #tpu.dot_dimension_numbers<[1], [0], [0], [1], [0, 0, 1, 1], [], []>} : vector<8x128xf32>, vector<128x128xf32>, vector<8x128xf32> -> vector<8x128xf32>
    %4 = vector.broadcast %2 : vector<1x128xf32> to vector<8x128xf32>
    %5 = arith.addf %3, %4 : vector<8x128xf32>
    %cst_5 = arith.constant 0.000000e+00 : f32
    %6 = vector.broadcast %cst_5 : f32 to vector<8x128xf32>
    %7 = arith.maximumf %5, %6 : vector<8x128xf32>
    %c0_6 = arith.constant 0 : index
    %c0_7 = arith.constant 0 : index
    %8 = vector.load %arg4[%c0_6, %c0_7] : memref<128x128xf32, #tpu.memory_space<vmem>>, vector<128x128xf32>
    %c0_8 = arith.constant 0 : index
    %c0_9 = arith.constant 0 : index
    %9 = vector.load %arg5[%c0_8, %c0_9] : memref<1x128xf32, #tpu.memory_space<vmem>>, vector<1x128xf32>
    %cst_10 = arith.constant dense<0.000000e+00> : vector<8x128xf32>
    %10 = tpu.matmul %7, %8, %cst_10 {dimension_numbers = #tpu.dot_dimension_numbers<[1], [0], [0], [1], [0, 0, 1, 1], [], []>} : vector<8x128xf32>, vector<128x128xf32>, vector<8x128xf32> -> vector<8x128xf32>
    %11 = vector.broadcast %9 : vector<1x128xf32> to vector<8x128xf32>
    %12 = arith.addf %10, %11 : vector<8x128xf32>
    %cst_11 = arith.constant 0.000000e+00 : f32
    %13 = vector.broadcast %cst_11 : f32 to vector<8x128xf32>
    %14 = arith.maximumf %12, %13 : vector<8x128xf32>
    %c0_12 = arith.constant 0 : index
    %c0_13 = arith.constant 0 : index
    %15 = vector.load %arg6[%c0_12, %c0_13] : memref<128x128xf32, #tpu.memory_space<vmem>>, vector<128x128xf32>
    %c0_14 = arith.constant 0 : index
    %c0_15 = arith.constant 0 : index
    %16 = vector.load %arg7[%c0_14, %c0_15] : memref<1x128xf32, #tpu.memory_space<vmem>>, vector<1x128xf32>
    %cst_16 = arith.constant dense<0.000000e+00> : vector<8x128xf32>
    %17 = tpu.matmul %14, %15, %cst_16 {dimension_numbers = #tpu.dot_dimension_numbers<[1], [0], [0], [1], [0, 0, 1, 1], [], []>} : vector<8x128xf32>, vector<128x128xf32>, vector<8x128xf32> -> vector<8x128xf32>
    %18 = vector.broadcast %16 : vector<1x128xf32> to vector<8x128xf32>
    %19 = arith.addf %17, %18 : vector<8x128xf32>
    %cst_17 = arith.constant 0.000000e+00 : f32
    %20 = vector.broadcast %cst_17 : f32 to vector<8x128xf32>
    %21 = arith.maximumf %19, %20 : vector<8x128xf32>
    %c0_18 = arith.constant 0 : index
    %c0_19 = arith.constant 0 : index
    %22 = vector.load %arg8[%c0_18, %c0_19] : memref<8x128xf32, #tpu.memory_space<vmem>>, vector<8x128xf32>
    tpu.vector_store %arg8[%c0_18, %c0_19], %21 {strides = array<i32>} : memref<8x128xf32, #tpu.memory_space<vmem>>, vector<8x128xf32>,
    return
  }
  func.func @transform_0(%arg0: i32) -> (i32, i32) {
    %c0_i32 = arith.constant 0 : i32
    %c0_i32_0 = arith.constant 0 : i32
    return %arg0, %c0_i32 : i32, i32
  }
  func.func @transform_1(%arg0: i32) -> (i32, i32) {
    %c0_i32 = arith.constant 0 : i32
    %c0_i32_0 = arith.constant 0 : i32
    %c0_i32_1 = arith.constant 0 : i32
    return %c0_i32, %c0_i32_0 : i32, i32
  }
  func.func @transform_2(%arg0: i32) -> (i32, i32) {
    %c0_i32 = arith.constant 0 : i32
    %c0_i32_0 = arith.constant 0 : i32
    %c0_i32_1 = arith.constant 0 : i32
    return %c0_i32, %c0_i32_0 : i32, i32
  }
  func.func @transform_3(%arg0: i32) -> (i32, i32) {
    %c0_i32 = arith.constant 0 : i32
    %c0_i32_0 = arith.constant 0 : i32
    %c0_i32_1 = arith.constant 0 : i32
    return %c0_i32, %c0_i32_0 : i32, i32
  }
  func.func @transform_4(%arg0: i32) -> (i32, i32) {
    %c0_i32 = arith.constant 0 : i32
    %c0_i32_0 = arith.constant 0 : i32
    %c0_i32_1 = arith.constant 0 : i32
    return %c0_i32, %c0_i32_0 : i32, i32
  }
  func.func @transform_5(%arg0: i32) -> (i32, i32) {
    %c0_i32 = arith.constant 0 : i32
    %c0_i32_0 = arith.constant 0 : i32
    %c0_i32_1 = arith.constant 0 : i32
    return %c0_i32, %c0_i32_0 : i32, i32
  }
  func.func @transform_6(%arg0: i32) -> (i32, i32) {
    %c0_i32 = arith.constant 0 : i32
    %c0_i32_0 = arith.constant 0 : i32
    %c0_i32_1 = arith.constant 0 : i32
    return %c0_i32, %c0_i32_0 : i32, i32
  }
  func.func @transform_7(%arg0: i32) -> (i32, i32) {
    %c0_i32 = arith.constant 0 : i32
    %c0_i32_0 = arith.constant 0 : i32
    return %arg0, %c0_i32 : i32, i32
  }
}

</mosaic_0001>

<bundles_post_ra>
// kernel: fc_embedding_forward.1
= control target key start
LH: loop header
LB: loop body
LE: loop exit
PB: predicated region body
PF: predicated region fallthrough
CT: control target
= control target key end

     0   :  { %12 = vsyncpa [#allocation3], 0  ;;  %s712_s0 = inlined_call_operand.vmem [shape: f32[8,128], index: 0, kind: input, shape index: {}]   ;;  %s713_s1 = inlined_call_operand.hbm [shape: f32[128,128], index: 1, kind: input, shape index: {}]   ;;  %s714_s2 = inlined_call_operand.vmem [shape: f32[1,128], index: 2, kind: input, shape index: {}]   ;;  %s715_s3 = inlined_call_operand.hbm [shape: f32[128,128], index: 3, kind: input, shape index: {}]   ;;  %s716_s4 = inlined_call_operand.vmem [shape: f32[1,128], index: 4, kind: input, shape index: {}]   ;;  %s717_s5 = inlined_call_operand.hbm [shape: f32[128,128], index: 5, kind: input, shape index: {}]   ;;  %s718_s6 = inlined_call_operand.vmem [shape: f32[1,128], index: 6, kind: input, shape index: {}]   ;;  %s719_s7 = inlined_call_operand.vmem [shape: f32[8,128], index: 7, kind: output, shape index: {}]  }
   0x1   :  { %13 = vsyncpa [#allocation5], 0  ;;  %s587_s24 = smov [#allocation4]   ;;  %s588_s26 = smov [#allocation2]  }
   0x2   :  { %s35_s25 = sshll.u32 %s587_s24, 4  ;;  %s21_s27 = sshll.u32 %s588_s26, 4  ;;  %s36_s25 = int_to_ptr.vmem [resolvable:$true] %s35_s25  ;;  %s22_s27 = int_to_ptr.vmem [resolvable:$true] %s21_s27 }
   0x3   :  { %s531_s28 = scalar_lea.vmem %s36_s25, 2048  ;;  %p536_p1 = scmp.lt.s32.totalorder %s36_s25, %s36_s25 }
   0x4   :  { %p532_p0 = scmp.ne.s32.totalorder %s36_s25, %s531_s28  ;;  %p537_p2 = scmp.lt.s32.totalorder %s531_s28, %s531_s28 }
   0x6   :  { %p538_p3 = por %p537_p2, %p536_p1 }
   0x8   :  { %p539_p4 = pnand %p538_p3, %p532_p0 }
   0xa   :  { %542 = shalt.err (!%p539_p4)
}
   0xb   :  { %s589_s29 = smov 128   ;;  %s590_s30 = smov 8  }
   0xc   :  { %41 = dma.hbm_to_vmem [thread:$0]  %s715_s3, 2048, %s36_s25, [#allocation5], %s589_s29, %s589_s29, %s590_s30  }
   0xd   :  { %s551_s10 = scalar_lea.vmem %s22_s27, 2048  ;;  %p556_p6 = scmp.lt.s32.totalorder %s22_s27, %s22_s27 }
   0xe   :  { %p552_p5 = scmp.ne.s32.totalorder %s22_s27, %s551_s10  ;;  %p557_p7 = scmp.lt.s32.totalorder %s551_s10, %s551_s10 }
  0x10   :  { %p558_p8 = por %p557_p7, %p556_p6 }
  0x12   :  { %p559_p9 = pnand %p558_p8, %p552_p5 }
  0x14   :  { %562 = shalt.err (!%p559_p9)
}
  0x15   :  { %27 = dma.hbm_to_vmem [thread:$0]  %s713_s1, 2048, %s22_s27, [#allocation3], %s589_s29, %s589_s29, %s590_s30  }
  0x16   :  { %s591_s13 = smov [#allocation6]  }
  0x17   :  { %s49_s14 = sshll.u32 %s591_s13, 4  ;;  %s50_s14 = int_to_ptr.vmem [resolvable:$true] %s49_s14 }
  0x18   :  { %s571_s15 = scalar_lea.vmem %s50_s14, 2048  ;;  %p576_p11 = scmp.lt.s32.totalorder %s50_s14, %s50_s14 }
  0x19   :  { %p572_p10 = scmp.ne.s32.totalorder %s50_s14, %s571_s15  ;;  %p577_p12 = scmp.lt.s32.totalorder %s571_s15, %s571_s15 }
  0x1b   :  { %p578_p13 = por %p577_p12, %p576_p11 }
  0x1d   :  { %p579_p0 = pnand %p578_p13, %p572_p10 }
  0x1f   :  { %582 = shalt.err (!%p579_p0)
}
  0x20   :  { %55 = dma.hbm_to_vmem [thread:$0]  %s717_s5, 2048, %s50_s14, [#allocation5], %s589_s29, %s589_s29, %s590_s30  }
  0x21   :  { %583 = dma.done.wait [#allocation3], 2048  }
  0x22   :  { %584 = vsyncadd [#allocation3], 4294965248 }
  0x23   :  { %585 = dma.done.wait [#allocation5], 4096  }
  0x24   :  { %586 = vsyncadd [#allocation5], 4294963200  ;;  %v592_v0 = vmov 0.0   ;;  %vm593_vm0 = vmmov 0   ;;  %v83_v1 = vld [vmem:[#allocation2 + $0x78] sm:$0xff]  ;;  %v82_v2 = vld [vmem:[#allocation2 + $0x70] sm:$0xff] }
  0x25   :  { %411 = vmatprep.subr.mxu0 %v592_v0  ;;  %443 = vmatprep.mubr.msk.f32.mxu0 %vm593_vm0, %v592_v0  ;;  %v81_v3 = vld [vmem:[#allocation2 + $0x68] sm:$0xff]  ;;  %v80_v4 = vld [vmem:[#allocation2 + $0x60] sm:$0xff]  ;;  %v177_v5 = vld [vmem:[#allocation4 + $0x78] sm:$0xff] }
  0x26   :  { %446 = vmatprep.subr.mxu1 %v592_v0  ;;  %478 = vmatprep.mubr.msk.f32.mxu1 %vm593_vm0, %v592_v0  ;;  %v79_v6 = vld [vmem:[#allocation2 + $0x58] sm:$0xff]  ;;  %v176_v7 = vld [vmem:[#allocation4 + $0x70] sm:$0xff]  ;;  %v175_v8 = vld [vmem:[#allocation4 + $0x68] sm:$0xff] }
  0x27   :  { %412 = vmatpush3.msra.mxu0 %v83_v1  ;;  %447 = vmatpush3.msra.mxu1 %v177_v5  ;;  %v78_v9 = vld [vmem:[#allocation2 + $0x50] sm:$0xff]  ;;  %v174_v10 = vld [vmem:[#allocation4 + $0x60] sm:$0xff]  ;;  %v77_v11 = vld [vmem:[#allocation2 + $0x48] sm:$0xff] }
  0x28   :  { %413 = vmatprep.subr.mxu0 %v592_v0  ;;  %448 = vmatprep.subr.mxu1 %v592_v0  ;;  %v173_v12 = vld [vmem:[#allocation4 + $0x58] sm:$0xff]  ;;  %v76_v13 = vld [vmem:[#allocation2 + $0x40] sm:$0xff]  ;;  %v172_v14 = vld [vmem:[#allocation4 + $0x50] sm:$0xff] }
  0x29   :  { %414 = vmatpush3.msra.mxu0 %v82_v2  ;;  %449 = vmatpush3.msra.mxu1 %v176_v7  ;;  %v75_v15 = vld [vmem:[#allocation2 + $0x38] sm:$0xff]  ;;  %v171_v16 = vld [vmem:[#allocation4 + $0x48] sm:$0xff]  ;;  %v74_v17 = vld [vmem:[#allocation2 + $0x30] sm:$0xff] }
  0x2a   :  { %415 = vmatprep.subr.mxu0 %v592_v0  ;;  %450 = vmatprep.subr.mxu1 %v592_v0  ;;  %v170_v18 = vld [vmem:[#allocation4 + $0x40] sm:$0xff]  ;;  %v73_v19 = vld [vmem:[#allocation2 + $0x28] sm:$0xff]  ;;  %v169_v20 = vld [vmem:[#allocation4 + $0x38] sm:$0xff] }
  0x2b   :  { %416 = vmatpush3.msra.mxu0 %v81_v3  ;;  %451 = vmatpush3.msra.mxu1 %v175_v8  ;;  %v72_v21 = vld [vmem:[#allocation2 + $0x20] sm:$0xff]  ;;  %v168_v22 = vld [vmem:[#allocation4 + $0x30] sm:$0xff]  ;;  %v71_v23 = vld [vmem:[#allocation2 + $0x18] sm:$0xff] }
  0x2c   :  { %417 = vmatprep.subr.mxu0 %v592_v0  ;;  %452 = vmatprep.subr.mxu1 %v592_v0  ;;  %v167_v24 = vld [vmem:[#allocation4 + $0x28] sm:$0xff]  ;;  %v70_v25 = vld [vmem:[#allocation2 + $0x10] sm:$0xff]  ;;  %v166_v26 = vld [vmem:[#allocation4 + $0x20] sm:$0xff] }
  0x2d   :  { %418 = vmatpush3.msra.mxu0 %v80_v4  ;;  %453 = vmatpush3.msra.mxu1 %v174_v10  ;;  %v69_v27 = vld [vmem:[#allocation2 + $0x8] sm:$0xff]  ;;  %v165_v28 = vld [vmem:[#allocation4 + $0x18] sm:$0xff]  ;;  %v68_v29 = vld [vmem:[#allocation2] sm:$0xff] }
  0x2e   :  { %419 = vmatprep.subr.mxu0 %v592_v0  ;;  %454 = vmatprep.subr.mxu1 %v592_v0  ;;  %v67_v30 = vld [vmem:[%s712_s0] sm:$0xff]  ;;  %v164_v31 = vld [vmem:[#allocation4 + $0x10] sm:$0xff]  ;;  %v163_v32 = vld [vmem:[#allocation4 + $0x8] sm:$0xff] }
  0x2f   :  { %420 = vmatpush3.msra.mxu0 %v79_v6  ;;  %455 = vmatpush3.msra.mxu1 %v173_v12  ;;  %v162_v33 = vld [vmem:[#allocation4] sm:$0xff]  ;;  %v271_v34 = vld [vmem:[#allocation6 + $0x78] sm:$0xff]  ;;  %v270_v35 = vld [vmem:[#allocation6 + $0x70] sm:$0xff] }
  0x30   :  { %421 = vmatprep.subr.mxu0 %v592_v0  ;;  %456 = vmatprep.subr.mxu1 %v592_v0  ;;  %v269_v36 = vld [vmem:[#allocation6 + $0x68] sm:$0xff]  ;;  %v268_v37 = vld [vmem:[#allocation6 + $0x60] sm:$0xff]  ;;  %v267_v38 = vld [vmem:[#allocation6 + $0x58] sm:$0xff] }
  0x31   :  { %422 = vmatpush3.msra.mxu0 %v78_v9  ;;  %457 = vmatpush3.msra.mxu1 %v172_v14  ;;  %v266_v39 = vld [vmem:[#allocation6 + $0x50] sm:$0xff]  ;;  %v265_v40 = vld [vmem:[#allocation6 + $0x48] sm:$0xff]  ;;  %v264_v41 = vld [vmem:[#allocation6 + $0x40] sm:$0xff] }
  0x32   :  { %423 = vmatprep.subr.mxu0 %v592_v0  ;;  %458 = vmatprep.subr.mxu1 %v592_v0  ;;  %v263_v42 = vld [vmem:[#allocation6 + $0x38] sm:$0xff]  ;;  %v262_v43 = vld [vmem:[#allocation6 + $0x30] sm:$0xff]  ;;  %v261_v44 = vld [vmem:[#allocation6 + $0x28] sm:$0xff] }
  0x33   :  { %424 = vmatpush3.msra.mxu0 %v77_v11  ;;  %459 = vmatpush3.msra.mxu1 %v171_v16  ;;  %v260_v45 = vld [vmem:[#allocation6 + $0x20] sm:$0xff]  ;;  %v259_v46 = vld [vmem:[#allocation6 + $0x18] sm:$0xff]  ;;  %v258_v52 = vld [vmem:[#allocation6 + $0x10] sm:$0xff] }
  0x34   :  { %425 = vmatprep.subr.mxu0 %v592_v0  ;;  %460 = vmatprep.subr.mxu1 %v592_v0  ;;  %v357_v47 = vld [vmem:[%s714_s2] ss:$0 sm:$0xff]  ;;  %v257_v53 = vld [vmem:[#allocation6 + $0x8] sm:$0xff] }
  0x35   :  { %426 = vmatpush3.msra.mxu0 %v76_v13  ;;  %461 = vmatpush3.msra.mxu1 %v170_v18  ;;  %v256_v54 = vld [vmem:[#allocation6] sm:$0xff] }
  0x36   :  { %427 = vmatprep.subr.mxu0 %v592_v0  ;;  %462 = vmatprep.subr.mxu1 %v592_v0  ;;  %v358_v55 = vld [vmem:[%s716_s4] ss:$0 sm:$0xff] }
  0x37   :  { %428 = vmatpush3.msra.mxu0 %v75_v15  ;;  %463 = vmatpush3.msra.mxu1 %v169_v20  ;;  %v359_v60 = vld [vmem:[%s718_s6] ss:$0 sm:$0xff] }
  0x38   :  { %429 = vmatprep.subr.mxu0 %v592_v0  ;;  %464 = vmatprep.subr.mxu1 %v592_v0 }
  0x39   :  { %430 = vmatpush3.msra.mxu0 %v74_v17  ;;  %465 = vmatpush3.msra.mxu1 %v168_v22 }
  0x3a   :  { %431 = vmatprep.subr.mxu0 %v592_v0  ;;  %466 = vmatprep.subr.mxu1 %v592_v0 }
  0x3b   :  { %432 = vmatpush3.msra.mxu0 %v73_v19  ;;  %467 = vmatpush3.msra.mxu1 %v167_v24 }
  0x3c   :  { %433 = vmatprep.subr.mxu0 %v592_v0  ;;  %468 = vmatprep.subr.mxu1 %v592_v0 }
  0x3d   :  { %434 = vmatpush3.msra.mxu0 %v72_v21  ;;  %469 = vmatpush3.msra.mxu1 %v166_v26 }
  0x3e   :  { %435 = vmatprep.subr.mxu0 %v592_v0  ;;  %470 = vmatprep.subr.mxu1 %v592_v0 }
  0x3f   :  { %436 = vmatpush3.msra.mxu0 %v71_v23  ;;  %471 = vmatpush3.msra.mxu1 %v165_v28 }
  0x40   :  { %437 = vmatprep.subr.mxu0 %v592_v0  ;;  %472 = vmatprep.subr.mxu1 %v592_v0 }
  0x41   :  { %438 = vmatpush3.msra.mxu0 %v70_v25  ;;  %473 = vmatpush3.msra.mxu1 %v164_v31 }
  0x42   :  { %439 = vmatprep.subr.mxu0 %v592_v0  ;;  %474 = vmatprep.subr.mxu1 %v592_v0 }
  0x43   :  { %440 = vmatpush3.msra.mxu0 %v69_v27  ;;  %475 = vmatpush3.msra.mxu1 %v163_v32 }
  0x44   :  { %441 = vmatprep.subr.mxu0 %v592_v0  ;;  %476 = vmatprep.subr.mxu1 %v592_v0 }
  0x45   :  { %442 = vmatpush3.msra.mxu0 %v68_v29  ;;  %477 = vmatpush3.msra.mxu1 %v162_v33 }
  0x46   :  { %444 = vmatmul.mubr.f32.vlgmr.msra.gmra.mxu0 %v67_v30  ;;  %481 = vmatprep.subr.mxu0 %v592_v0 }
  0x47   :  { %513 = vmatprep.mubr.msk.f32.mxu0 %vm593_vm0, %v592_v0  ;;  %482 = vmatpush3.msra.mxu0 %v271_v34 }
  0x48   :  { %483 = vmatprep.subr.mxu0 %v592_v0 }
  0x49   :  { %484 = vmatpush3.msra.mxu0 %v270_v35 }
  0x4a   :  { %485 = vmatprep.subr.mxu0 %v592_v0 }
  0x4b   :  { %486 = vmatpush3.msra.mxu0 %v269_v36 }
  0x4c   :  { %487 = vmatprep.subr.mxu0 %v592_v0 }
  0x4d   :  { %488 = vmatpush3.msra.mxu0 %v268_v37 }
  0x4e   :  { %489 = vmatprep.subr.mxu0 %v592_v0 }
  0x4f   :  { %490 = vmatpush3.msra.mxu0 %v267_v38 }
  0x50   :  { %491 = vmatprep.subr.mxu0 %v592_v0 }
  0x51   :  { %492 = vmatpush3.msra.mxu0 %v266_v39 }
  0x52   :  { %493 = vmatprep.subr.mxu0 %v592_v0 }
  0x53   :  { %494 = vmatpush3.msra.mxu0 %v265_v40 }
  0x54   :  { %495 = vmatprep.subr.mxu0 %v592_v0 }
  0x55   :  { %496 = vmatpush3.msra.mxu0 %v264_v41 }
  0x56   :  { %497 = vmatprep.subr.mxu0 %v592_v0 }
  0x57   :  { %498 = vmatpush3.msra.mxu0 %v263_v42 }
  0x58   :  { %499 = vmatprep.subr.mxu0 %v592_v0 }
  0x59   :  { %500 = vmatpush3.msra.mxu0 %v262_v43 }
  0x5a   :  { %501 = vmatprep.subr.mxu0 %v592_v0 }
  0x5b   :  { %502 = vmatpush3.msra.mxu0 %v261_v44 }
  0x5c   :  { %503 = vmatprep.subr.mxu0 %v592_v0 }
  0x5d   :  { %504 = vmatpush3.msra.mxu0 %v260_v45 }
  0x5e   :  { %505 = vmatprep.subr.mxu0 %v592_v0 }
  0x5f   :  { %506 = vmatpush3.msra.mxu0 %v259_v46 }
  0x60   :  { %507 = vmatprep.subr.mxu0 %v592_v0 }
  0x61   :  { %508 = vmatpush3.msra.mxu0 %v258_v52 }
  0x62   :  { %509 = vmatprep.subr.mxu0 %v592_v0 }
  0x63   :  { %510 = vmatpush3.msra.mxu0 %v257_v53 }
  0x64   :  { %511 = vmatprep.subr.mxu0 %v592_v0 }
  0x65   :  { %512 = vmatpush3.msra.mxu0 %v256_v54 }
 0x106   :  { %v157_v48 = vpop.f32.mrf.mxu0 }
 0x107   :  { %v158_v49 = vadd.f32 %v357_v47, %v157_v48 }
 0x108   :  { %v445_v50 = vpop.f32.mrf.mxu0 }
 0x109   :  { %v161_v51 = vmax.f32 %v158_v49, 0.0 }
 0x10b   :  { %479 = vmatmul.mubr.f32.vlgmr.msra.gmra.mxu1 %v161_v51 }
 0x1cb   :  { %v251_v56 = vpop.f32.mrf.mxu1 }
 0x1cc   :  { %v252_v57 = vadd.f32 %v358_v55, %v251_v56 }
 0x1cd   :  { %v480_v58 = vpop.f32.mrf.mxu1 }
 0x1ce   :  { %v255_v59 = vmax.f32 %v252_v57, 0.0 }
 0x1d0   :  { %514 = vmatmul.mubr.f32.vlgmr.msra.gmra.mxu0 %v255_v59 }
 0x290   :  { %v345_v61 = vpop.f32.mrf.mxu0 }
 0x291   :  { %v346_v62 = vadd.f32 %v359_v60, %v345_v61 }
 0x292   :  { %v515_v63 = vpop.f32.mrf.mxu0 }
 0x293   :  { %v349_v1 = vmax.f32 %v346_v62, 0.0 }
 0x295   :  { %350 = vst [vmem:[%s719_s7] sm:$0xff] %v349_v1 }
 0x296   :  { %355 = vsyncpa [#allocation3], 1 }
 0x297   :  { %356 = vsyncpa [#allocation5], 1 }

</bundles_post_ra>
